<compile_context>
chip_gen: v5e
topology: v5e:2x2
jax: 0.10.0
libtpu: 0.0.40
codegen_flags: <defaults>
</compile_context>

<pallas_src>
import math
import functools

import jax
import jax.numpy as jnp
from jax import lax
from jax.experimental import pallas as pl
from jax.experimental.pallas import tpu as pltpu


def _mha_kernel(q_ref, k_ref, v_ref,
                wq_ref, bq_ref, wk_ref, bk_ref, wo_ref, bo_ref,
                o_ref, concat_ref, *, n_heads: int):
    """Fused MHA for one (batch, query-tile) grid step.

    Weights arrive pre-transposed to (in, out) and (for Q) pre-scaled by
    1/sqrt(d_k), so there is no in-kernel weight transpose and no elementwise
    scale on the (TQ, S) score matrix.  Per-head attention outputs are written
    into a (TQ, D) concat scratch so the output projection is a single big
    (TQ, D) @ (D, D) MXU matmul instead of H tiny-K matmuls.
    """
    q_in = q_ref[0]            # (TQ, D) f32
    k_in = k_ref[0]            # (S,  D) f32
    v_in = v_ref[0]            # (S,  D) f32

    wq = wq_ref[...]           # (D, D) bf16, (in, out), 1/sqrt(d_k) folded in
    wk = wk_ref[...]           # (D, D) bf16, (in, out)
    wo = wo_ref[...]           # (D, D) bf16, (in, out)
    bq = bq_ref[...]           # (1, D) f32, 1/sqrt(d_k) folded in
    bk = bk_ref[...]           # (1, D) f32
    bo = bo_ref[...]           # (1, D) f32

    TQ, D = q_in.shape
    d_k = D // n_heads

    # Input projections: x @ W on the MXU (bf16 in, f32 accumulate), bias in f32.
    # NOTE: xv intentionally uses wk/bk (k_linear applied to v in the reference).
    xq = jnp.dot(q_in.astype(jnp.bfloat16), wq,
                 preferred_element_type=jnp.float32) + bq
    xk = jnp.dot(k_in.astype(jnp.bfloat16), wk,
                 preferred_element_type=jnp.float32) + bk
    xv = jnp.dot(v_in.astype(jnp.bfloat16), wk,
                 preferred_element_type=jnp.float32) + bk

    xq_b = xq.astype(jnp.bfloat16)
    xk_b = xk.astype(jnp.bfloat16)
    xv_b = xv.astype(jnp.bfloat16)

    # Per-head scaled-dot-product attention.
    # TODO(synk): if n_heads grows (>=8-16) or d_k >= 128, batch heads into a
    # leading dim (einsum) instead of unrolled lane slices to keep vreg pressure
    # low and lane slices 128-wide.
    for h in range(n_heads):
        lo = h * d_k
        hi = lo + d_k
        qh = xq_b[:, lo:hi]    # (TQ, d_k)
        kh = xk_b[:, lo:hi]    # (S,  d_k)
        vh = xv_b[:, lo:hi]    # (S,  d_k)

        # scores = q @ k^T via dot_general contracting last dims -> MXU handles
        # the rhs-transpose path, no materialized transpose.  Scale is already
        # folded into the Q projection.
        s = lax.dot_general(qh, kh, (((1,), (1,)), ((), ())),
                            preferred_element_type=jnp.float32)       # (TQ, S)
        s = s - jnp.max(s, axis=-1, keepdims=True)
        p = jnp.exp(s)
        # approx reciprocal -> EUP slot (otherwise idle), off the VALU path.
        p = p * pl.reciprocal(jnp.sum(p, axis=-1, keepdims=True), approx=True)

        head = jnp.dot(p.astype(jnp.bfloat16), vh,
                       preferred_element_type=jnp.float32)            # (TQ, d_k)
        concat_ref[:, lo:hi] = head

    # Single fused output projection over the full contraction dim D.
    out = jnp.dot(concat_ref[...].astype(jnp.bfloat16), wo,
                  preferred_element_type=jnp.float32) + bo             # (TQ, D)
    o_ref[0] = out.astype(o_ref.dtype)


def multi_head_attention(q, k, v, params, *, n_heads: int, q_tile=None):
    """q, k, v: (B, S, D) float32.  params: PyTorch-layout weights (see init)."""
    B, S, D = q.shape
    assert D % n_heads == 0
    d_k = D // n_heads

    # Query-tile grid axis: bounds the per-step (TQ, S) score matrix in VMEM and
    # provides extra parallel grid steps (megacore / pipeline overlap) beyond B.
    # TODO(synk): for very large S also stream K/V flash-style instead of keeping
    # the full (S, D) K/V block (and its projection) per query tile.
    if q_tile is None:
        q_tile = S if S <= 128 else 128
    assert S % q_tile == 0
    num_q_tiles = S // q_tile

    inv_sqrt_dk = 1.0 / math.sqrt(d_k)

    # Host-side constant folding (weights are constants):
    #  * transpose (out, in) -> (in, out): kernel computes x @ W, no XLU transpose
    #  * fold the 1/sqrt(d_k) score scale into the Q projection (weight + bias)
    #  * cast weights to bf16 for single-pass MXU matmuls (halves weight traffic)
    wq_t = (params["wq"].T * inv_sqrt_dk).astype(jnp.bfloat16)
    wk_t = params["wk"].T.astype(jnp.bfloat16)
    wo_t = params["wo"].T.astype(jnp.bfloat16)
    bq_s = (params["bq"] * inv_sqrt_dk).astype(jnp.float32)
    bk = params["bk"].astype(jnp.float32)
    bo = params["bo"].astype(jnp.float32)

    kernel = functools.partial(_mha_kernel, n_heads=n_heads)

    q_spec = pl.BlockSpec((1, q_tile, D), lambda b, t: (b, t, 0))
    kv_spec = pl.BlockSpec((1, S, D), lambda b, t: (b, 0, 0))
    # Weights/biases are grid-invariant (index_map always (0, 0)); the pipeliner
    # does not re-DMA blocks whose index does not change across steps.
    w_spec = pl.BlockSpec((D, D), lambda b, t: (0, 0))
    b_spec = pl.BlockSpec((1, D), lambda b, t: (0, 0))
    out_spec = pl.BlockSpec((1, q_tile, D), lambda b, t: (b, t, 0))

    return pl.pallas_call(
        kernel,
        out_shape=jax.ShapeDtypeStruct((B, S, D), q.dtype),
        grid_spec=pltpu.PrefetchScalarGridSpec(
            num_scalar_prefetch=0,
            grid=(B, num_q_tiles),
            in_specs=[q_spec, kv_spec, kv_spec,
                      w_spec, b_spec, w_spec, b_spec, w_spec, b_spec],
            out_specs=out_spec,
            scratch_shapes=[pltpu.VMEM((q_tile, D), jnp.float32)],
        ),
        compiler_params=pltpu.CompilerParams(
            dimension_semantics=("parallel", "parallel"),
            # Explicit scoped-VMEM budget (safe on v5e/v6e/v7x); re-derive tile
            # sizes against 64 MiB physical when targeting v7x at large D/S.
            vmem_limit_bytes=32 * 1024 * 1024,
        ),
    )(q, k, v, wq_t, bq_s, wk_t, bk, wo_t, bo)


def init_params(key, d_model):
    """Deterministic synthetic weights, PyTorch Linear layout (out, in) + (1, out)."""
    ks = jax.random.split(key, 8)
    scale = 1.0 / math.sqrt(d_model)
    def lin(kw, kb):
        w = jax.random.uniform(kw, (d_model, d_model), jnp.float32, -scale, scale)
        b = jax.random.uniform(kb, (1, d_model), jnp.float32, -scale, scale)
        return w, b
    wq, bq = lin(ks[0], ks[1])
    wk, bk = lin(ks[2], ks[3])
    # v_linear exists in __init__ but is unused in forward (k_linear is applied to v).
    wo, bo = lin(ks[6], ks[7])
    return {"wq": wq, "bq": bq, "wk": wk, "bk": bk, "wo": wo, "bo": bo}


def reference_mha(q, k, v, params, *, n_heads: int):
    """Pure-JAX f32 reference mirroring the PyTorch forward (eval mode, mask=None)."""
    B, S, D = q.shape
    d_k = D // n_heads
    xq = q @ params["wq"].T + params["bq"]
    xk = k @ params["wk"].T + params["bk"]
    xv = v @ params["wk"].T + params["bk"]          # k_linear applied to v
    def split(x):  # (B, S, D) -> (B, H, S, d_k)
        return x.reshape(B, S, n_heads, d_k).transpose(0, 2, 1, 3)
    qh, kh, vh = split(xq), split(xk), split(xv)
    scores = jnp.einsum("bhqd,bhkd->bhqk", qh, kh) / math.sqrt(d_k)
    probs = jax.nn.softmax(scores, axis=-1)
    out = jnp.einsum("bhqk,bhkd->bhqd", probs, vh)
    concat = out.transpose(0, 2, 1, 3).reshape(B, S, D)
    return concat @ params["wo"].T + params["bo"]


if __name__ == "__main__":
    B, S, D, H = 2, 8, 32, 4

    key = jax.random.PRNGKey(0)
    kp, kq, kk, kv = jax.random.split(key, 4)
    params = init_params(kp, D)
    q = jax.random.normal(kq, (B, S, D), jnp.float32)
    k = jax.random.normal(kk, (B, S, D), jnp.float32)
    v = jax.random.normal(kv, (B, S, D), jnp.float32)

    out = multi_head_attention(q, k, v, params, n_heads=H)
    out = jax.block_until_ready(out)

    ref = reference_mha(q, k, v, params, n_heads=H)
    assert out.shape == (B, S, D)
    # Tolerance loosened vs the f32 reference because matmuls run in bf16 on the
    # MXU (f32 accumulation) and softmax uses the approx EUP reciprocal.
    assert jnp.allclose(out, ref, atol=2e-2, rtol=2e-2), "mismatch vs JAX reference"

    print("KERNEL_OK")
</pallas_src>

<mosaic_0001>
module attributes {stable_mosaic.version = 11 : i64} {
  func.func @_mha_kernel(%arg0: i32, %arg1: i32, %arg2: memref<1x8x32xf32, #tpu.memory_space<vmem>>, %arg3: memref<1x8x32xf32, #tpu.memory_space<vmem>>, %arg4: memref<1x8x32xf32, #tpu.memory_space<vmem>>, %arg5: memref<32x32xbf16, #tpu.memory_space<vmem>>, %arg6: memref<1x32xf32, #tpu.memory_space<vmem>>, %arg7: memref<32x32xbf16, #tpu.memory_space<vmem>>, %arg8: memref<1x32xf32, #tpu.memory_space<vmem>>, %arg9: memref<32x32xbf16, #tpu.memory_space<vmem>>, %arg10: memref<1x32xf32, #tpu.memory_space<vmem>>, %arg11: memref<1x8x32xf32, #tpu.memory_space<vmem>>, %arg12: memref<8x32xf32, #tpu.memory_space<vmem>>) attributes {dimension_semantics = [#tpu.dimension_semantics<parallel>, #tpu.dimension_semantics<parallel>], iteration_bounds = array<i64: 2, 1>, scalar_prefetch = 0 : i64, scratch_operands = 1 : i64, tpu.core_type = #tpu.core_type<tc>, window_params = [{transform_indices = @transform_0, window_bounds = array<i64: 1, 8, 32>}, {transform_indices = @transform_1, window_bounds = array<i64: 1, 8, 32>}, {transform_indices = @transform_2, window_bounds = array<i64: 1, 8, 32>}, {pipeline_mode = #tpu.pipeline_mode<synchronous>, transform_indices = @transform_3, window_bounds = array<i64: 32, 32>}, {pipeline_mode = #tpu.pipeline_mode<synchronous>, transform_indices = @transform_4, window_bounds = array<i64: 1, 32>}, {pipeline_mode = #tpu.pipeline_mode<synchronous>, transform_indices = @transform_5, window_bounds = array<i64: 32, 32>}, {pipeline_mode = #tpu.pipeline_mode<synchronous>, transform_indices = @transform_6, window_bounds = array<i64: 1, 32>}, {pipeline_mode = #tpu.pipeline_mode<synchronous>, transform_indices = @transform_7, window_bounds = array<i64: 32, 32>}, {pipeline_mode = #tpu.pipeline_mode<synchronous>, transform_indices = @transform_8, window_bounds = array<i64: 1, 32>}, {transform_indices = @transform_9, window_bounds = array<i64: 1, 8, 32>}]} {
    %c0 = arith.constant 0 : index
    %c0_0 = arith.constant 0 : index
    %c0_1 = arith.constant 0 : index
    %0 = vector.load %arg2[%c0, %c0_0, %c0_1] : memref<1x8x32xf32, #tpu.memory_space<vmem>>, vector<1x8x32xf32>
    %1 = vector.shape_cast %0 : vector<1x8x32xf32> to vector<8x32xf32>
    %c0_2 = arith.constant 0 : index
    %c0_3 = arith.constant 0 : index
    %c0_4 = arith.constant 0 : index
    %2 = vector.load %arg3[%c0_2, %c0_3, %c0_4] : memref<1x8x32xf32, #tpu.memory_space<vmem>>, vector<1x8x32xf32>
    %3 = vector.shape_cast %2 : vector<1x8x32xf32> to vector<8x32xf32>
    %c0_5 = arith.constant 0 : index
    %c0_6 = arith.constant 0 : index
    %c0_7 = arith.constant 0 : index
    %4 = vector.load %arg4[%c0_5, %c0_6, %c0_7] : memref<1x8x32xf32, #tpu.memory_space<vmem>>, vector<1x8x32xf32>
    %5 = vector.shape_cast %4 : vector<1x8x32xf32> to vector<8x32xf32>
    %c0_8 = arith.constant 0 : index
    %c0_9 = arith.constant 0 : index
    %6 = vector.load %arg5[%c0_8, %c0_9] : memref<32x32xbf16, #tpu.memory_space<vmem>>, vector<32x32xbf16>
    %c0_10 = arith.constant 0 : index
    %c0_11 = arith.constant 0 : index
    %7 = vector.load %arg7[%c0_10, %c0_11] : memref<32x32xbf16, #tpu.memory_space<vmem>>, vector<32x32xbf16>
    %c0_12 = arith.constant 0 : index
    %c0_13 = arith.constant 0 : index
    %8 = vector.load %arg9[%c0_12, %c0_13] : memref<32x32xbf16, #tpu.memory_space<vmem>>, vector<32x32xbf16>
    %c0_14 = arith.constant 0 : index
    %c0_15 = arith.constant 0 : index
    %9 = vector.load %arg6[%c0_14, %c0_15] : memref<1x32xf32, #tpu.memory_space<vmem>>, vector<1x32xf32>
    %c0_16 = arith.constant 0 : index
    %c0_17 = arith.constant 0 : index
    %10 = vector.load %arg8[%c0_16, %c0_17] : memref<1x32xf32, #tpu.memory_space<vmem>>, vector<1x32xf32>
    %c0_18 = arith.constant 0 : index
    %c0_19 = arith.constant 0 : index
    %11 = vector.load %arg10[%c0_18, %c0_19] : memref<1x32xf32, #tpu.memory_space<vmem>>, vector<1x32xf32>
    %12 = arith.truncf %1 : vector<8x32xf32> to vector<8x32xbf16>
    %cst = arith.constant dense<0.000000e+00> : vector<8x32xf32>
    %13 = tpu.matmul %12, %6, %cst {dimension_numbers = #tpu.dot_dimension_numbers<[1], [0], [0], [1], [0, 0, 1, 1], [], []>} : vector<8x32xbf16>, vector<32x32xbf16>, vector<8x32xf32> -> vector<8x32xf32>
    %14 = vector.broadcast %9 : vector<1x32xf32> to vector<8x32xf32>
    %15 = arith.addf %13, %14 : vector<8x32xf32>
    %16 = arith.truncf %3 : vector<8x32xf32> to vector<8x32xbf16>
    %cst_20 = arith.constant dense<0.000000e+00> : vector<8x32xf32>
    %17 = tpu.matmul %16, %7, %cst_20 {dimension_numbers = #tpu.dot_dimension_numbers<[1], [0], [0], [1], [0, 0, 1, 1], [], []>} : vector<8x32xbf16>, vector<32x32xbf16>, vector<8x32xf32> -> vector<8x32xf32>
    %18 = vector.broadcast %10 : vector<1x32xf32> to vector<8x32xf32>
    %19 = arith.addf %17, %18 : vector<8x32xf32>
    %20 = arith.truncf %5 : vector<8x32xf32> to vector<8x32xbf16>
    %cst_21 = arith.constant dense<0.000000e+00> : vector<8x32xf32>
    %21 = tpu.matmul %20, %7, %cst_21 {dimension_numbers = #tpu.dot_dimension_numbers<[1], [0], [0], [1], [0, 0, 1, 1], [], []>} : vector<8x32xbf16>, vector<32x32xbf16>, vector<8x32xf32> -> vector<8x32xf32>
    %22 = vector.broadcast %10 : vector<1x32xf32> to vector<8x32xf32>
    %23 = arith.addf %21, %22 : vector<8x32xf32>
    %24 = arith.truncf %15 : vector<8x32xf32> to vector<8x32xbf16>
    %25 = arith.truncf %19 : vector<8x32xf32> to vector<8x32xbf16>
    %26 = arith.truncf %23 : vector<8x32xf32> to vector<8x32xbf16>
    %27 = vector.extract_strided_slice %24 {offsets = [0, 0], sizes = [8, 8], strides = [1, 1]} : vector<8x32xbf16> to vector<8x8xbf16>
    %28 = vector.extract_strided_slice %25 {offsets = [0, 0], sizes = [8, 8], strides = [1, 1]} : vector<8x32xbf16> to vector<8x8xbf16>
    %29 = vector.extract_strided_slice %26 {offsets = [0, 0], sizes = [8, 8], strides = [1, 1]} : vector<8x32xbf16> to vector<8x8xbf16>
    %cst_22 = arith.constant dense<0.000000e+00> : vector<8x8xf32>
    %30 = tpu.matmul %27, %28, %cst_22 {dimension_numbers = #tpu.dot_dimension_numbers<[1], [1], [0], [0], [0, 0, 1, 0], [], []>} : vector<8x8xbf16>, vector<8x8xbf16>, vector<8x8xf32> -> vector<8x8xf32>
    %cst_23 = arith.constant dense<0xFF800000> : vector<8xf32>
    %31 = vector.multi_reduction <maximumf>, %30, %cst_23 [1] : vector<8x8xf32> to vector<8xf32>
    %32 = vector.shape_cast %31 : vector<8xf32> to vector<8x1xf32>
    %33 = vector.broadcast %32 : vector<8x1xf32> to vector<8x8xf32>
    %34 = arith.subf %30, %33 : vector<8x8xf32>
    %35 = math.exp %34 : vector<8x8xf32>
    %cst_24 = arith.constant dense<0.000000e+00> : vector<8xf32>
    %36 = vector.multi_reduction <add>, %35, %cst_24 [1] : vector<8x8xf32> to vector<8xf32>
    %37 = vector.shape_cast %36 : vector<8xf32> to vector<8x1xf32>
    %38 = tpu.reciprocal %37 {approx = true} : vector<8x1xf32> -> vector<8x1xf32>
    %39 = vector.broadcast %38 : vector<8x1xf32> to vector<8x8xf32>
    %40 = arith.mulf %35, %39 : vector<8x8xf32>
    %41 = arith.truncf %40 : vector<8x8xf32> to vector<8x8xbf16>
    %cst_25 = arith.constant dense<0.000000e+00> : vector<8x8xf32>
    %42 = tpu.matmul %41, %29, %cst_25 {dimension_numbers = #tpu.dot_dimension_numbers<[1], [0], [0], [1], [0, 0, 1, 1], [], []>} : vector<8x8xbf16>, vector<8x8xbf16>, vector<8x8xf32> -> vector<8x8xf32>
    %c0_26 = arith.constant 0 : index
    %c0_27 = arith.constant 0 : index
    %43 = vector.load %arg12[%c0_26, %c0_27] : memref<8x32xf32, #tpu.memory_space<vmem>>, vector<8x8xf32>
    tpu.vector_store %arg12[%c0_26, %c0_27], %42 {strides = array<i32>} : memref<8x32xf32, #tpu.memory_space<vmem>>, vector<8x8xf32>,
    %44 = vector.extract_strided_slice %24 {offsets = [0, 8], sizes = [8, 8], strides = [1, 1]} : vector<8x32xbf16> to vector<8x8xbf16>
    %45 = vector.extract_strided_slice %25 {offsets = [0, 8], sizes = [8, 8], strides = [1, 1]} : vector<8x32xbf16> to vector<8x8xbf16>
    %46 = vector.extract_strided_slice %26 {offsets = [0, 8], sizes = [8, 8], strides = [1, 1]} : vector<8x32xbf16> to vector<8x8xbf16>
    %cst_28 = arith.constant dense<0.000000e+00> : vector<8x8xf32>
    %47 = tpu.matmul %44, %45, %cst_28 {dimension_numbers = #tpu.dot_dimension_numbers<[1], [1], [0], [0], [0, 0, 1, 0], [], []>} : vector<8x8xbf16>, vector<8x8xbf16>, vector<8x8xf32> -> vector<8x8xf32>
    %cst_29 = arith.constant dense<0xFF800000> : vector<8xf32>
    %48 = vector.multi_reduction <maximumf>, %47, %cst_29 [1] : vector<8x8xf32> to vector<8xf32>
    %49 = vector.shape_cast %48 : vector<8xf32> to vector<8x1xf32>
    %50 = vector.broadcast %49 : vector<8x1xf32> to vector<8x8xf32>
    %51 = arith.subf %47, %50 : vector<8x8xf32>
    %52 = math.exp %51 : vector<8x8xf32>
    %cst_30 = arith.constant dense<0.000000e+00> : vector<8xf32>
    %53 = vector.multi_reduction <add>, %52, %cst_30 [1] : vector<8x8xf32> to vector<8xf32>
    %54 = vector.shape_cast %53 : vector<8xf32> to vector<8x1xf32>
    %55 = tpu.reciprocal %54 {approx = true} : vector<8x1xf32> -> vector<8x1xf32>
    %56 = vector.broadcast %55 : vector<8x1xf32> to vector<8x8xf32>
    %57 = arith.mulf %52, %56 : vector<8x8xf32>
    %58 = arith.truncf %57 : vector<8x8xf32> to vector<8x8xbf16>
    %cst_31 = arith.constant dense<0.000000e+00> : vector<8x8xf32>
    %59 = tpu.matmul %58, %46, %cst_31 {dimension_numbers = #tpu.dot_dimension_numbers<[1], [0], [0], [1], [0, 0, 1, 1], [], []>} : vector<8x8xbf16>, vector<8x8xbf16>, vector<8x8xf32> -> vector<8x8xf32>
    %c0_32 = arith.constant 0 : index
    %c8 = arith.constant 8 : index
    %60 = vector.load %arg12[%c0_32, %c8] : memref<8x32xf32, #tpu.memory_space<vmem>>, vector<8x8xf32>
    tpu.vector_store %arg12[%c0_32, %c8], %59 {strides = array<i32>} : memref<8x32xf32, #tpu.memory_space<vmem>>, vector<8x8xf32>,
    %61 = vector.extract_strided_slice %24 {offsets = [0, 16], sizes = [8, 8], strides = [1, 1]} : vector<8x32xbf16> to vector<8x8xbf16>
    %62 = vector.extract_strided_slice %25 {offsets = [0, 16], sizes = [8, 8], strides = [1, 1]} : vector<8x32xbf16> to vector<8x8xbf16>
    %63 = vector.extract_strided_slice %26 {offsets = [0, 16], sizes = [8, 8], strides = [1, 1]} : vector<8x32xbf16> to vector<8x8xbf16>
    %cst_33 = arith.constant dense<0.000000e+00> : vector<8x8xf32>
    %64 = tpu.matmul %61, %62, %cst_33 {dimension_numbers = #tpu.dot_dimension_numbers<[1], [1], [0], [0], [0, 0, 1, 0], [], []>} : vector<8x8xbf16>, vector<8x8xbf16>, vector<8x8xf32> -> vector<8x8xf32>
    %cst_34 = arith.constant dense<0xFF800000> : vector<8xf32>
    %65 = vector.multi_reduction <maximumf>, %64, %cst_34 [1] : vector<8x8xf32> to vector<8xf32>
    %66 = vector.shape_cast %65 : vector<8xf32> to vector<8x1xf32>
    %67 = vector.broadcast %66 : vector<8x1xf32> to vector<8x8xf32>
    %68 = arith.subf %64, %67 : vector<8x8xf32>
    %69 = math.exp %68 : vector<8x8xf32>
    %cst_35 = arith.constant dense<0.000000e+00> : vector<8xf32>
    %70 = vector.multi_reduction <add>, %69, %cst_35 [1] : vector<8x8xf32> to vector<8xf32>
    %71 = vector.shape_cast %70 : vector<8xf32> to vector<8x1xf32>
    %72 = tpu.reciprocal %71 {approx = true} : vector<8x1xf32> -> vector<8x1xf32>
    %73 = vector.broadcast %72 : vector<8x1xf32> to vector<8x8xf32>
    %74 = arith.mulf %69, %73 : vector<8x8xf32>
    %75 = arith.truncf %74 : vector<8x8xf32> to vector<8x8xbf16>
    %cst_36 = arith.constant dense<0.000000e+00> : vector<8x8xf32>
    %76 = tpu.matmul %75, %63, %cst_36 {dimension_numbers = #tpu.dot_dimension_numbers<[1], [0], [0], [1], [0, 0, 1, 1], [], []>} : vector<8x8xbf16>, vector<8x8xbf16>, vector<8x8xf32> -> vector<8x8xf32>
    %c0_37 = arith.constant 0 : index
    %c16 = arith.constant 16 : index
    %77 = vector.load %arg12[%c0_37, %c16] : memref<8x32xf32, #tpu.memory_space<vmem>>, vector<8x8xf32>
    tpu.vector_store %arg12[%c0_37, %c16], %76 {strides = array<i32>} : memref<8x32xf32, #tpu.memory_space<vmem>>, vector<8x8xf32>,
    %78 = vector.extract_strided_slice %24 {offsets = [0, 24], sizes = [8, 8], strides = [1, 1]} : vector<8x32xbf16> to vector<8x8xbf16>
    %79 = vector.extract_strided_slice %25 {offsets = [0, 24], sizes = [8, 8], strides = [1, 1]} : vector<8x32xbf16> to vector<8x8xbf16>
    %80 = vector.extract_strided_slice %26 {offsets = [0, 24], sizes = [8, 8], strides = [1, 1]} : vector<8x32xbf16> to vector<8x8xbf16>
    %cst_38 = arith.constant dense<0.000000e+00> : vector<8x8xf32>
    %81 = tpu.matmul %78, %79, %cst_38 {dimension_numbers = #tpu.dot_dimension_numbers<[1], [1], [0], [0], [0, 0, 1, 0], [], []>} : vector<8x8xbf16>, vector<8x8xbf16>, vector<8x8xf32> -> vector<8x8xf32>
    %cst_39 = arith.constant dense<0xFF800000> : vector<8xf32>
    %82 = vector.multi_reduction <maximumf>, %81, %cst_39 [1] : vector<8x8xf32> to vector<8xf32>
    %83 = vector.shape_cast %82 : vector<8xf32> to vector<8x1xf32>
    %84 = vector.broadcast %83 : vector<8x1xf32> to vector<8x8xf32>
    %85 = arith.subf %81, %84 : vector<8x8xf32>
    %86 = math.exp %85 : vector<8x8xf32>
    %cst_40 = arith.constant dense<0.000000e+00> : vector<8xf32>
    %87 = vector.multi_reduction <add>, %86, %cst_40 [1] : vector<8x8xf32> to vector<8xf32>
    %88 = vector.shape_cast %87 : vector<8xf32> to vector<8x1xf32>
    %89 = tpu.reciprocal %88 {approx = true} : vector<8x1xf32> -> vector<8x1xf32>
    %90 = vector.broadcast %89 : vector<8x1xf32> to vector<8x8xf32>
    %91 = arith.mulf %86, %90 : vector<8x8xf32>
    %92 = arith.truncf %91 : vector<8x8xf32> to vector<8x8xbf16>
    %cst_41 = arith.constant dense<0.000000e+00> : vector<8x8xf32>
    %93 = tpu.matmul %92, %80, %cst_41 {dimension_numbers = #tpu.dot_dimension_numbers<[1], [0], [0], [1], [0, 0, 1, 1], [], []>} : vector<8x8xbf16>, vector<8x8xbf16>, vector<8x8xf32> -> vector<8x8xf32>
    %c0_42 = arith.constant 0 : index
    %c24 = arith.constant 24 : index
    %94 = vector.load %arg12[%c0_42, %c24] : memref<8x32xf32, #tpu.memory_space<vmem>>, vector<8x8xf32>
    tpu.vector_store %arg12[%c0_42, %c24], %93 {strides = array<i32>} : memref<8x32xf32, #tpu.memory_space<vmem>>, vector<8x8xf32>,
    %c0_43 = arith.constant 0 : index
    %c0_44 = arith.constant 0 : index
    %95 = vector.load %arg12[%c0_43, %c0_44] : memref<8x32xf32, #tpu.memory_space<vmem>>, vector<8x32xf32>
    %96 = arith.truncf %95 : vector<8x32xf32> to vector<8x32xbf16>
    %cst_45 = arith.constant dense<0.000000e+00> : vector<8x32xf32>
    %97 = tpu.matmul %96, %8, %cst_45 {dimension_numbers = #tpu.dot_dimension_numbers<[1], [0], [0], [1], [0, 0, 1, 1], [], []>} : vector<8x32xbf16>, vector<32x32xbf16>, vector<8x32xf32> -> vector<8x32xf32>
    %98 = vector.broadcast %11 : vector<1x32xf32> to vector<8x32xf32>
    %99 = arith.addf %97, %98 : vector<8x32xf32>
    %c0_46 = arith.constant 0 : index
    %c0_47 = arith.constant 0 : index
    %c0_48 = arith.constant 0 : index
    %100 = vector.load %arg11[%c0_46, %c0_47, %c0_48] : memref<1x8x32xf32, #tpu.memory_space<vmem>>, vector<1x8x32xf32>
    %101 = vector.shape_cast %100 : vector<1x8x32xf32> to vector<8x32xf32>
    %102 = vector.shape_cast %99 : vector<8x32xf32> to vector<1x8x32xf32>
    tpu.vector_store %arg11[%c0_46, %c0_47, %c0_48], %102 {strides = array<i32>} : memref<1x8x32xf32, #tpu.memory_space<vmem>>, vector<1x8x32xf32>,
    return
  }
  func.func @transform_0(%arg0: i32, %arg1: i32) -> (i32, i32, i32) {
    %c0_i32 = arith.constant 0 : i32
    %c0_i32_0 = arith.constant 0 : i32
    return %arg0, %arg1, %c0_i32 : i32, i32, i32
  }
  func.func @transform_1(%arg0: i32, %arg1: i32) -> (i32, i32, i32) {
    %c0_i32 = arith.constant 0 : i32
    %c0_i32_0 = arith.constant 0 : i32
    %c0_i32_1 = arith.constant 0 : i32
    return %arg0, %c0_i32, %c0_i32_0 : i32, i32, i32
  }
  func.func @transform_2(%arg0: i32, %arg1: i32) -> (i32, i32, i32) {
    %c0_i32 = arith.constant 0 : i32
    %c0_i32_0 = arith.constant 0 : i32
    %c0_i32_1 = arith.constant 0 : i32
    return %arg0, %c0_i32, %c0_i32_0 : i32, i32, i32
  }
  func.func @transform_3(%arg0: i32, %arg1: i32) -> (i32, i32) {
    %c0_i32 = arith.constant 0 : i32
    %c0_i32_0 = arith.constant 0 : i32
    %c0_i32_1 = arith.constant 0 : i32
    return %c0_i32, %c0_i32_0 : i32, i32
  }
  func.func @transform_4(%arg0: i32, %arg1: i32) -> (i32, i32) {
    %c0_i32 = arith.constant 0 : i32
    %c0_i32_0 = arith.constant 0 : i32
    %c0_i32_1 = arith.constant 0 : i32
    return %c0_i32, %c0_i32_0 : i32, i32
  }
  func.func @transform_5(%arg0: i32, %arg1: i32) -> (i32, i32) {
    %c0_i32 = arith.constant 0 : i32
    %c0_i32_0 = arith.constant 0 : i32
    %c0_i32_1 = arith.constant 0 : i32
    return %c0_i32, %c0_i32_0 : i32, i32
  }
  func.func @transform_6(%arg0: i32, %arg1: i32) -> (i32, i32) {
    %c0_i32 = arith.constant 0 : i32
    %c0_i32_0 = arith.constant 0 : i32
    %c0_i32_1 = arith.constant 0 : i32
    return %c0_i32, %c0_i32_0 : i32, i32
  }
  func.func @transform_7(%arg0: i32, %arg1: i32) -> (i32, i32) {
    %c0_i32 = arith.constant 0 : i32
    %c0_i32_0 = arith.constant 0 : i32
    %c0_i32_1 = arith.constant 0 : i32
    return %c0_i32, %c0_i32_0 : i32, i32
  }
  func.func @transform_8(%arg0: i32, %arg1: i32) -> (i32, i32) {
    %c0_i32 = arith.constant 0 : i32
    %c0_i32_0 = arith.constant 0 : i32
    %c0_i32_1 = arith.constant 0 : i32
    return %c0_i32, %c0_i32_0 : i32, i32
  }
  func.func @transform_9(%arg0: i32, %arg1: i32) -> (i32, i32, i32) {
    %c0_i32 = arith.constant 0 : i32
    %c0_i32_0 = arith.constant 0 : i32
    return %arg0, %arg1, %c0_i32 : i32, i32, i32
  }
}

</mosaic_0001>

<bundles_post_ra>
// kernel: tpu_custom_call.1
= control target key start
LH: loop header
LB: loop body
LE: loop exit
PB: predicated region body
PF: predicated region fallthrough
CT: control target
= control target key end

     0   :  { %s1853_s0 = inlined_call_operand.hbm [shape: f32[2,8,32], index: 0, kind: input, shape index: {}]   ;;  %s1854_s1 = inlined_call_operand.hbm [shape: f32[2,8,32], index: 1, kind: input, shape index: {}]   ;;  %s1855_s2 = inlined_call_operand.hbm [shape: f32[2,8,32], index: 2, kind: input, shape index: {}]   ;;  %s1856_s3 = inlined_call_operand.hbm [shape: bf16[32,32], index: 3, kind: input, shape index: {}]   ;;  %s1857_s4 = inlined_call_operand.vmem [shape: f32[1,32], index: 4, kind: input, shape index: {}]   ;;  %s1858_s5 = inlined_call_operand.hbm [shape: bf16[32,32], index: 5, kind: input, shape index: {}]   ;;  %s1859_s6 = inlined_call_operand.vmem [shape: f32[1,32], index: 6, kind: input, shape index: {}]   ;;  %s1860_s7 = inlined_call_operand.hbm [shape: bf16[32,32], index: 7, kind: input, shape index: {}]   ;;  %s1861_s8 = inlined_call_operand.vmem [shape: f32[1,32], index: 8, kind: input, shape index: {}]   ;;  %s1862_s9 = inlined_call_operand.hbm [shape: f32[2,8,32], index: 9, kind: output, shape index: {}]  }
   0x1   :  { %1877 = sst [smem:[#allocation27_spill]] %s1854_s1 }
   0x2   :  { %1878 = sst [smem:[#allocation28_spill]] %s1856_s3 }
   0x3   :  { %1879 = sst [smem:[#allocation29_spill]] %s1858_s5 }
   0x4   :  { %1880 = sst [smem:[#allocation30_spill]] %s1860_s7 }
   0x5   :  { %1881 = sst [smem:[#allocation31_spill]] %s1861_s8 }
   0x6   :  { %1882 = sst [smem:[#allocation32_spill]] %s1862_s9 }
   0x7   :  { %14 = vsyncpa [#allocation4], 0 }
   0x8   :  { %16 = vsyncpa [#allocation4 + $0x1], 0 }
   0x9   :  { %17 = vsyncpa [#allocation7], 0 }
   0xa   :  { %19 = vsyncpa [#allocation7 + $0x1], 0 }
   0xb   :  { %20 = vsyncpa [#allocation10], 0 }
   0xc   :  { %21 = vsyncpa [#allocation13], 0 }
   0xd   :  { %22 = vsyncpa [#allocation5], 0 }
   0xe   :  { %24 = vsyncpa [#allocation5 + $0x1], 0  ;;  %s1581_s30 = smov 0   ;;  %s1583_s10 = smov 0  }
   0xf   :  { %s1585_s11 = smov 0   ;;  %s1587_s12 = smov 0  }
  0x10   :  { %s1589_s13 = smov 0   ;;  %s1591_s14 = smov 0  }
  0x11 LB: > { %1883 = sst [smem:[#allocation20_spill]] %s1498_s30  ;;  %s1612_s15 = sadd.s32 4294967295, %s1518_s14   ;;  %s1518_s14 = sphi %s1591_s14, %s30_s14   ;;  %s1514_s13 = sphi %s1589_s13, %s1912_s13   ;;  %s1510_s12 = sphi %s1587_s12, %s1911_s12   ;;  %s1506_s11 = sphi %s1585_s11, %s1915_s11   ;;  %s1502_s10 = sphi %s1583_s10, %s1914_s10   ;;  %s1498_s30 = sphi %s1581_s30, %s1913_s30  }
  0x12   : > { %1884 = sst [smem:[#allocation21_spill]] %s1514_s13  ;;  %p1049_p0 = scmp.ge.s32.totalorder %s1518_s14, 1 }
  0x13   : > { %1885 = sst [smem:[#allocation22_spill]] %s1518_s14  ;;  %p65_p1 = scmp.eq.s32.totalorder %s1612_s15, 0 }
  0x14   : > { %p281_p2 = scmp.lt.s32.totalorder %s1518_s14, 3  ;;  %s1886_s3 = sld [smem:[#allocation28_spill]] }
  0x15   : > { %s1520_s20 = smov [#allocation9]   ;;  %p1053_p6 = scmp.ge.s32.totalorder %s1518_s14, 2 }
  0x16   : > { %p1620_p3 = pnand %p1049_p0, %p281_p2  ;;  %s294_s21 = sshll.u32 %s1520_s20, 4  ;;  %s295_s21 = int_to_ptr.vmem [resolvable:$true] %s294_s21 }
  0x17   : > { %s1863_s23 = smov 64   ;;  %s1865_s24 = smov 4  }
  0x18   : > { %p1134_p4 = pneg %p1620_p3  ;;  %s1048_s25 = sadd.s32 4294967294, %s1518_s14  }
  0x19   : > { %s42_s26 = sadd.s32 1, %s1514_s13  ;;  %s51_s27 = sadd.s32 1, %s1506_s11 }
  0x1a   : > { %s292_s18 = sshll.u32 %s1886_s3, 4  ;;  %p1628_p5 = pnand %p1134_p4, %p65_p1  ;;  %s293_s18 = int_to_ptr.hbm [resolvable:$true] %s292_s18 }
  0x1b   : > { %p44_p7 = scmp.ge.s32.totalorder %s42_s26, 2  ;;  %p58_p8 = scmp.ne.s32.totalorder %s1506_s11, %s1502_s10 }
  0x1c   : > { %1137 = dma.hbm_to_vmem [thread:$0]  (!%p1628_p5), %s293_s18, 256, %s295_s21, [#allocation10], %s1863_s23, %s1863_s23, %s1865_s24  }
  0x1d   : > { %p59_p9 = scmp.eq.s32.totalorder %s1518_s14, 0  ;;  %p64_p10 = scmp.ne.s32.totalorder %s1502_s10, %s1498_s30 }
  0x1e   : > { %s1917_s26 = smov (%p44_p7, %s42_s26), 0  ;;  %p268_p13 = scmp.eq.s32.totalorder %s1612_s15, 1 }
  0x1f   : > { %1889 = sst [smem:[#allocation23_spill]] %s1917_s26  ;;  %p1648_p11 = por %p59_p9, %p58_p8 }
  0x20   : > { %p1654_p12 = por %p65_p1, %p64_p10  ;;  %s46_s16 = ssub.s32 %s1514_s13, %s1917_s26 }
  0x21   : > { %p49_p0 = scmp.eq.s32.totalorder %s46_s16, 0  ;;  %p274_p2 = scmp.eq.s32.totalorder %s1048_s25, 1 }
  0x22   : > { %p1661_p4 = por %p268_p13, %p58_p8  ;;  %p1161_p7 = scmp.lt.s32.totalorder %s1518_s14, 2 }
  0x23   : > { %s1667_s18 = scalar_select %p49_p0, %s1506_s11, %s51_s27  }
  0x24   : > { %s1892_s17 = scalar_select %p1661_p4, 1, 0 }
  0x25   : > { %1894 = sst [smem:[#allocation25_spill]] %s1667_s18  ;;  %p1669_p9 = por %p274_p2, %p64_p10 }
  0x26   : > { %1893 = sst [smem:[#allocation24_spill]] %s1892_s17  ;;  %s1869_s21 = sand.u32 1, %s1506_s11  }
  0x27   : > { %s1895_s20 = scalar_select %p1669_p9, 1, 0 }
  0x28   : > { %s1676_s23 = sshll.u32 %s1869_s21, 3  ;;  %s1679_s24 = sshll.u32 %s1514_s13, 3 }
  0x29   : > { %1896 = sst [smem:[#allocation26_spill]] %s1895_s20  ;;  %p1683_p8 = pnand %p1161_p7, %p1648_p11 }
  0x2a   : > { %s365_s27 = sand.u32 1, %s1518_s14   ;;  %s1898_s1 = sld [smem:[#allocation27_spill]] }
  0x2b   : > { %s369_s20 = scalar_lea.vmem [#allocation6], %s1676_s23  ;;  %s1693_s28 = scalar_lea.sflag [#allocation7], %s365_s27 }
  0x2c   : > { %s377_s21 = sshll.u32 %s369_s20, 4  ;;  %s1899_s5 = sld [smem:[#allocation29_spill]]  ;;  %s378_s21 = int_to_ptr.vmem [resolvable:$true] %s377_s21 }
  0x2d   : > { %s1523_s3 = smov [#allocation11]   ;;  %s1900_s7 = sld [smem:[#allocation30_spill]] }
  0x2e   : > { %s1901_s27 = smov 4   ;;  %s1902_s8 = smov 64  }
  0x2f   : > { %s1524_s30 = smov [#allocation12]   ;;  %s349_s20 = scalar_lea.vmem [#allocation3], %s1676_s23 }
  0x30   : > { %s373_s26 = scalar_lea.hbm %s1898_s1, %s1679_s24  ;;  %s328_s13 = sshll.u32 %s1524_s30, 4  ;;  %s329_s13 = int_to_ptr.vmem [resolvable:$true] %s328_s13 }
  0x31   : > { %s375_s18 = sshll.u32 %s373_s26, 4  ;;  %s311_s26 = sshll.u32 %s1523_s3, 4  ;;  %s376_s18 = int_to_ptr.hbm [resolvable:$true] %s375_s18  ;;  %s312_s26 = int_to_ptr.vmem [resolvable:$true] %s311_s26 }
  0x32   : > { %1150 = dma.hbm_to_vmem [thread:$0]  (!%p1683_p8), %s376_s18, 128, %s378_s21, %s1693_s28  }
  0x33   : > { %s309_s14 = sshll.u32 %s1899_s5, 4  ;;  %s326_s1 = sshll.u32 %s1900_s7, 4  ;;  %s310_s14 = int_to_ptr.hbm [resolvable:$true] %s309_s14  ;;  %s327_s1 = int_to_ptr.hbm [resolvable:$true] %s326_s1 }
  0x34   : > { %1140 = dma.hbm_to_vmem [thread:$0]  (!%p1628_p5), %s310_s14, 256, %s312_s26, [#allocation10], %s1902_s8, %s1902_s8, %s1901_s27  }
  0x35   : > { %1143 = dma.hbm_to_vmem [thread:$0]  (!%p1628_p5), %s327_s1, 256, %s329_s13, [#allocation13], %s1902_s8, %s1902_s8, %s1901_s27  }
  0x36   : > { %s354_s3 = scalar_lea.hbm %s1853_s0, %s1679_s24  ;;  %s358_s16 = sshll.u32 %s349_s20, 4  ;;  %s359_s16 = int_to_ptr.vmem [resolvable:$true] %s358_s16 }
  0x37   : > { %s356_s5 = sshll.u32 %s354_s3, 4  ;;  %s1903_s14 = sand.u32 1, %s1506_s11   ;;  %s357_s5 = int_to_ptr.hbm [resolvable:$true] %s356_s5 }
  0x38   : > { %s346_s26 = scalar_lea.sflag [#allocation4], %s1903_s14  ;;  %s392_s7 = scalar_lea.hbm %s1855_s2, %s1679_s24 }
  0x39   : > { %1147 = dma.hbm_to_vmem [thread:$0]  (!%p1683_p8), %s357_s5, 128, %s359_s16, %s346_s26  }
  0x3a   : > { %s388_s17 = scalar_lea.vmem [#allocation8], %s1676_s23  ;;  %s394_s1 = sshll.u32 %s392_s7, 4  ;;  %s395_s1 = int_to_ptr.hbm [resolvable:$true] %s394_s1 }
  0x3b   : > { %s396_s9 = sshll.u32 %s388_s17, 4  ;;  %405 = sbr.rel (%p1620_p3) target bundleno = 1152 (0x480), region = 56  ;;  %s397_s9 = int_to_ptr.vmem [resolvable:$true] %s396_s9 }
  0x3c   : > { %1153 = dma.hbm_to_vmem [thread:$0]  (!%p1683_p8), %s395_s1, 128, %s397_s9, %s1693_s28  }
  0x3d   : > { %s1734_s8 = sand.u32 (!%p1620_p3), 1, %s1502_s10  }
  0x3e   : > { %s1737_s5 = sshll.u32 (!%p1620_p3), %s1734_s8, 3  ;;  %s408_s24 = scalar_lea.sflag (!%p1620_p3), [#allocation4], %s1734_s8 }
  0x3f   : > { %s411_s23 = scalar_lea.vmem (!%p1620_p3), [#allocation3], %s1737_s5 }
  0x40   : > { %1477 = dma.done.wait (%p1654_p12), %s408_s24, 128  }
  0x41   : > { %1479 = vsyncadd (%p1654_p12), %s408_s24, 4294967168  ;;  %s417_s7 = sand.u32 1, %s1612_s15   ;;  %s421_s19 = scalar_lea.vmem [#allocation6], %s1737_s5 }
  0x42   : > { %s418_s9 = scalar_lea.sflag [#allocation7], %s417_s7 }
  0x43   : > { %1481 = dma.done.wait (%p1654_p12), %s418_s9, 256  }
  0x44   : > { %1483 = vsyncadd (%p1654_p12), %s418_s9, 4294967040  ;;  %s431_s17 = scalar_lea.vmem [#allocation8], %s1737_s5 }
  0x45   : > { %1485 = dma.done.wait (%p65_p1), [#allocation10], 512  }
  0x46   : > { %1487 = vsyncadd (%p65_p1), [#allocation10], 4294966784 }
  0x47   : > { %1489 = dma.done.wait (%p65_p1), [#allocation13], 256  }
  0x48   : > { %1491 = vsyncadd (%p65_p1), [#allocation13], 4294967040  ;;  %v1109_v0 = vld [vmem:[#allocation9 + $0x8] sm:$0xff]  ;;  %v1111_v1 = vld [vmem:[#allocation11 + $0x8] sm:$0xff]  ;;  %vm527_vm0 = vcmask 261120   ;;  %vm596_vm1 = vcmask 64512  }
  0x49   : > { %v1108_v2 = vld [vmem:[#allocation9] sm:$0xff]  ;;  %v1110_v3 = vld [vmem:[#allocation11] sm:$0xff]  ;;  %537 = vmatpush.bf16.msra.mxu0 %v1109_v0  ;;  %569 = vmatpush.bf16.msra.mxu1 %v1111_v1  ;;  %v1225_v8 = vld [vmem:[%s1857_s4] ss:$0 sm:$0xff]  ;;  %s1525_s27 = smov 112   ;;  %s1526_s13 = smov 120  }
  0x4a   : > { %v493_v4 = vld [vmem:[%s411_s23] sm:$0xff]  ;;  %v494_v5 = vld [vmem:[%s421_s19] sm:$0xff]  ;;  %586 = vmatpush.bf16.msra.mxu2 %v1111_v1  ;;  %s1527_s18 = smov 104   ;;  %vm631_vm2 = vcmask 1043456   ;;  %s1528_s21 = smov 8   ;;  %vm718_vm3 = vcmask 130112  }
  0x4b   : > { %v511_v6 = vpack.c.bf16 %v493_v4, %v493_v4  ;;  %v544_v7 = vpack.c.bf16 %v494_v5, %v494_v5  ;;  %v1768_v9 = vld [vmem:[%s1859_s6] ss:$0 sm:$0xff]  ;;  %v495_v35 = vld [vmem:[%s431_s17] sm:$0xff]  ;;  %s1529_s3 = smov 24   ;;  %s1530_s20 = smov 16   ;;  %vm780_vm4 = vcmask 195712  }
  0x4c   : > { %v576_v36 = vpack.c.bf16 %v495_v35, %v495_v35  ;;  %vm842_vm5 = vcmask 261312   ;;  %s1105_s16 = sshll.u32 %s1510_s12, 3  ;;  %s1904_s22 = sld [smem:[#allocation32_spill]] }
  0x4d   : > { %538 = vmatpush.bf16.msra.mxu0 %v1108_v2  ;;  %570 = vmatpush.bf16.msra.mxu1 %v1110_v3  ;;  %s1906_s7 = sld [smem:[#allocation31_spill]]  ;;  %s491_s9 = scalar_lea.vmem [#allocation14], %s1737_s5 }
  0x4e   : > { %587 = vmatpush.bf16.msra.mxu2 %v1110_v3  ;;  %s892_s19 = sshll.u32 %s491_s9, 4  ;;  %s879_s15 = scalar_lea.sflag [#allocation5], %s1734_s8  ;;  %s893_s19 = int_to_ptr.vmem [resolvable:$true] %s892_s19 }
  0x50   : > { %1076 = vmatmul.msk.bf16.vlgmr.msra.gmra.mxu0 %vm527_vm0, %v511_v6  ;;  %1085 = vmatmul.msk.bf16.vlgmr.msra.gmra.mxu1 %vm527_vm0, %v544_v7 }
  0x51   : > { %1086 = vmatmul.msk.bf16.vlgmr.msra.gmra.mxu2 %vm527_vm0, %v576_v36 }
  0x52   : > { %s890_s1 = scalar_lea.hbm %s1904_s22, %s1105_s16  ;;  %s1444_s5 = scalar_lea.hbm %s1904_s22, 16 }
  0x53   : > { %s894_s17 = sshll.u32 %s890_s1, 4  ;;  %s895_s17 = int_to_ptr.hbm [resolvable:$true] %s894_s17 }
  0x54   : > { %s1438_s12 = sshra.s32 %s895_s17, 4  ;;  %s1439_s12 = int_to_ptr.hbm [resolvable:$true] %s1438_s12 }
  0x55   : > { %s1440_s29 = scalar_lea.hbm %s1439_s12, 8  ;;  %p1445_p10 = scmp.lt.s32.totalorder %s1439_s12, %s1904_s22 }
  0x56   : > { %p1441_p1 = scmp.ne.s32.totalorder %s1439_s12, %s1440_s29  ;;  %p1446_p11 = scmp.lt.s32.totalorder %s1444_s5, %s1440_s29 }
  0x58   : > { %p1442_p3 = pnand %p1441_p1, %p1661_p4  ;;  %p1447_p12 = por %p1446_p11, %p1445_p10 }
  0x5a   : > { %p1443_p5 = pneg %p1442_p3 }
  0x5c   : > { %p1448_p13 = pnand %p1447_p12, %p1443_p5 }
  0xcd   : > { %v540_v10 = vpop.f32.mrf.mxu0  ;;  %v572_v11 = vpop.f32.mrf.mxu1 }
  0xce   : > { %v541_v12 = vadd.f32 %v1225_v8, %v540_v10  ;;  %v573_v13 = vadd.f32 %v1768_v9, %v572_v11 }
  0xd0   : > { %v593_v14 = vpack.c.bf16 %v541_v12, %v541_v12  ;;  %v594_v15 = vpack.c.bf16 %v573_v13, %v573_v13 }
  0xd2   : > { %v650_v16 = vunpack.c.l.b16 %v593_v14  ;;  %v655_v17 = vunpack.c.l.b16 %v594_v15  ;;  %v601_v18 = vsel %vm596_vm1, %v594_v15, 0 }
  0xd3   : > { %610 = vmatpush.bf16.xpose.msra.mxu3 %v601_v18 }
  0xd4   : > { %v651_v19 = vpack.c.b16 %v650_v16, %v650_v16  ;;  %v656_v20 = vpack.c.b16 %v655_v17, %v655_v17  ;;  %v589_v51 = vpop.f32.mrf.mxu2 }
  0xd5   : > { %v542_v21 = vpop.f32.mrf.mxu0  ;;  %v574_v22 = vpop.f32.mrf.mxu1  ;;  %v590_v52 = vadd.f32 %v1768_v9, %v589_v51 }
  0xd6   : > { %722 = vrot.lane.b32.xlu1 %v656_v20, %s1525_s27  ;;  %657 = vrot.lane.b32.xlu0 %v656_v20, %s1526_s13 }
  0xd7   : > { %720 = vrot.lane.b32.xlu2 %v651_v19, %s1525_s27  ;;  %v595_v53 = vpack.c.bf16 %v590_v52, %v590_v52 }
  0xd9   : > { %v691_v54 = vunpack.c.l.b16 %v595_v53  ;;  %v633_v55 = vsel %vm631_vm2, %v595_v53, 0 }
  0xda   : > { %1087 = vmatmul.msk.bf16.vlgmr.msra.gmra.mxu3 %vm596_vm1, %v593_v14  ;;  %642 = vmatpush.bf16.msrb.mxu0 %v633_v55 }
  0xdb   : > { %v692_v56 = vpack.c.b16 %v691_v54, %v691_v54 }
  0xdc   : > { %v591_v57 = vpop.f32.mrf.mxu2 }
  0xde   : > { %784 = vrot.lane.b32.xlu1 %v656_v20, %s1527_s18  ;;  %652 = vrot.lane.b32.xlu0 %v651_v19, %s1526_s13 }
  0xdf   : > { %782 = vrot.lane.b32.xlu2 %v651_v19, %s1527_s18 }
 0x131   : > { %v721_v27 = vpop.permute.xlu2 %720 }
 0x139   : > { %v783_v33 = vpop.permute.xlu2 %782 }
 0x148   : > { %v723_v23 = vpop.permute.xlu1 %722  ;;  %v658_v24 = vpop.permute.xlu0 %657 }
 0x149   : > { %v663_v25 = vsel %vm596_vm1, %v658_v24, 0  ;;  %v728_v26 = vsel %vm596_vm1, %v723_v23, 0 }
 0x14a   : > { %672 = vmatpush.bf16.xpose.msrb.mxu1 %v663_v25  ;;  %737 = vmatpush.bf16.xpose.msrb.mxu3 %v728_v26 }
 0x150   : > { %v785_v28 = vpop.permute.xlu1 %784  ;;  %v653_v29 = vpop.permute.xlu0 %652 }
 0x151   : > { %v790_v30 = vsel %vm596_vm1, %v785_v28, 0  ;;  %1089 = vmatmul.msk.bf16.vlgmr.msrb.gmra.mxu1 %vm596_vm1, %v653_v29  ;;  %1091 = vmatmul.msk.bf16.vlgmr.msrb.gmra.mxu3 %vm596_vm1, %v721_v27 }
 0x152   : > { %799 = vmatpush.bf16.xpose.msra.mxu1 %v790_v30 }
 0x15d   : > { %v612_v31 = vpop.f32.mrf.mxu3 }
 0x15e   : > { %v616_v32 = vsel %vm596_vm1, %v612_v31, -inf }
 0x15f   : > { %617 = vmax.xlane.f32.xlu1 %v616_v32 }
 0x161   : > { %1093 = vmatmul.msk.bf16.vlgmr.msra.gmra.mxu1 %vm596_vm1, %v783_v33 }
 0x165   : > { %v614_v34 = vpop.f32.mrf.mxu3 }
 0x1ce   : > { %v674_v37 = vpop.f32.mrf.mxu1 }
 0x1cf   : > { %v678_v38 = vsel %vm596_vm1, %v674_v37, -inf }
 0x1d0   : > { %679 = vmax.xlane.f32.xlu0 %v678_v38 }
 0x1d2   : > { %v618_v39 = vpop.xlane.xlu1 %617 }
 0x1d3   : > { %v619_v40 = vsub.f32 %v612_v31, %v618_v39 }
 0x1d4   : > { %v739_v41 = vpop.f32.mrf.mxu3 }
 0x1d5   : > { %v620_v42 = vmul.f32 1.442695, %v619_v40  ;;  %v743_v50 = vsel %vm596_vm1, %v739_v41, -inf  ;;  %v1113_v40 = vld [vmem:[#allocation12 + $0x8] sm:$0xff] }
 0x1d6   : > { %v676_v43 = vpop.f32.mrf.mxu1  ;;  %870 = vmatpush.bf16.msra.mxu3 %v1113_v40 }
 0x1d7   : > { %1228 = vpow2.f32 %v620_v42 }
 0x1dc   : > { %v741_v44 = vpop.f32.mrf.mxu3 }
 0x1dd   : > { %v1229_v45 = vpop.eup %1228 }
 0x1de   : > { %v801_v46 = vpop.f32.mrf.mxu1  ;;  %v622_v47 = vsel %vm596_vm1, %v1229_v45, 0.0 }
 0x1df   : > { %623 = vadd.xlane.f32.xlu1 %v622_v47  ;;  %v805_v48 = vsel %vm596_vm1, %v801_v46, -inf }
 0x1e0   : > { %806 = vmax.xlane.f32.xlu2 %v805_v48 }
 0x1e6   : > { %v803_v49 = vpop.f32.mrf.mxu1 }
 0x1e8   : > { %744 = vmax.xlane.f32.xlu2 %v743_v50 }
 0x200   : > { %693 = vrot.lane.b32.xlu2 %v692_v56, %s1526_s13 }
 0x243   : > { %v680_v58 = vpop.xlane.xlu0 %679 }
 0x244   : > { %v681_v59 = vsub.f32 %v674_v37, %v680_v58 }
 0x246   : > { %v682_v60 = vmul.f32 1.442695, %v681_v59 }
 0x248   : > { %1230 = vpow2.f32 %v682_v60 }
 0x24e   : > { %v1231_v61 = vpop.eup %1230 }
 0x24f   : > { %v684_v62 = vsel %vm596_vm1, %v1231_v61, 0.0 }
 0x250   : > { %685 = vadd.xlane.f32.xlu0 %v684_v62 }
 0x252   : > { %v624_v63 = vpop.xlane.xlu1 %623 }
 0x253   : > { %1232 = vrcp.f32 %v624_v63  ;;  %v807_v0 = vpop.xlane.xlu2 %806 }
 0x254   : > { %v808_v1 = vsub.f32 %v801_v46, %v807_v0  ;;  %v1227_v46 = vld [vmem:[%s1906_s7] ss:$0 sm:$0xff] }
 0x256   : > { %v809_v2 = vmul.f32 1.442695, %v808_v1 }
 0x258   : > { %1234 = vpow2.f32 %v809_v2 }
 0x259   : > { %v1233_v3 = vpop.eup %1232 }
 0x25a   : > { %v626_v4 = vmul.f32 %v1233_v3, %v1229_v45 }
 0x25b   : > { %v745_v5 = vpop.xlane.xlu2 %744 }
 0x25c   : > { %v746_v6 = vsub.f32 %v739_v41, %v745_v5  ;;  %v627_v7 = vpack.c.bf16 %v626_v4, %v626_v4  ;;  %v1112_v41 = vld [vmem:[#allocation12] sm:$0xff] }
 0x25d   : > { %871 = vmatpush.bf16.msra.mxu3 %v1112_v41 }
 0x25e   : > { %v1235_v8 = vpop.eup %1234  ;;  %v747_v9 = vmul.f32 1.442695, %v746_v6  ;;  %1088 = vmatmul.msk.bf16.vlgmr.msrb.gmra.mxu0 %vm596_vm1, %v627_v7 }
 0x25f   : > { %v811_v10 = vsel %vm596_vm1, %v1235_v8, 0.0 }
 0x260   : > { %1236 = vpow2.f32 %v747_v9  ;;  %812 = vadd.xlane.f32.xlu0 %v811_v10 }
 0x263   : > { %v694_v13 = vpop.permute.xlu2 %693 }
 0x264   : > { %v699_v14 = vsel %vm631_vm2, %v694_v13, 0 }
 0x265   : > { %708 = vmatpush.bf16.msrb.mxu2 %v699_v14 }
 0x266   : > { %v1237_v11 = vpop.eup %1236 }
 0x267   : > { %v749_v12 = vsel %vm596_vm1, %v1237_v11, 0.0 }
 0x268   : > { %750 = vadd.xlane.f32.xlu1 %v749_v12 }
 0x274   : > { %817 = vrot.lane.b32.xlu0 %v692_v56, %s1527_s18 }
 0x281   : > { %755 = vrot.lane.b32.xlu1 %v692_v56, %s1525_s27 }
 0x2c3   : > { %v686_v15 = vpop.xlane.xlu0 %685 }
 0x2c4   : > { %1238 = vrcp.f32 %v686_v15 }
 0x2ca   : > { %v1239_v16 = vpop.eup %1238 }
 0x2cb   : > { %v688_v17 = vmul.f32 %v1239_v16, %v1231_v61 }
 0x2cd   : > { %v689_v18 = vpack.c.bf16 %v688_v17, %v688_v17 }
 0x2cf   : > { %1090 = vmatmul.msk.bf16.vlgmr.msrb.gmra.mxu2 %vm596_vm1, %v689_v18 }
 0x2d3   : > { %v813_v19 = vpop.xlane.xlu0 %812 }
 0x2d4   : > { %1240 = vrcp.f32 %v813_v19 }
 0x2da   : > { %v1241_v21 = vpop.eup %1240 }
 0x2db   : > { %v644_v20 = vpop.f32.mrf.mxu0  ;;  %v815_v23 = vmul.f32 %v1241_v21, %v1235_v8  ;;  %v751_v24 = vpop.xlane.xlu1 %750 }
 0x2dc   : > { %648 = vst.msk [vmem:[#allocation2] sm:$0xff] %vm596_vm1, %v644_v20  ;;  %1242 = vrcp.f32 %v751_v24 }
 0x2dd   : > { %v816_v27 = vpack.c.bf16 %v815_v23, %v815_v23 }
 0x2e2   : > { %v1243_v28 = vpop.eup %1242 }
 0x2e3   : > { %v646_v22 = vpop.f32.mrf.mxu0  ;;  %v753_v29 = vmul.f32 %v1243_v28, %v1237_v11 }
 0x2e5   : > { %v754_v32 = vpack.c.bf16 %v753_v29, %v753_v29 }
 0x2e6   : > { %v818_v25 = vpop.permute.xlu0 %817 }
 0x2e7   : > { %v823_v26 = vsel %vm631_vm2, %v818_v25, 0 }
 0x2e8   : > { %832 = vmatpush.bf16.msra.mxu2 %v823_v26 }
 0x2eb   : > { %1094 = vmatmul.msk.bf16.vlgmr.msra.gmra.mxu2 %vm596_vm1, %v816_v27 }
 0x2f3   : > { %v756_v30 = vpop.permute.xlu1 %755 }
 0x2f4   : > { %v761_v31 = vsel %vm631_vm2, %v756_v30, 0 }
 0x2f5   : > { %770 = vmatpush.bf16.msra.mxu0 %v761_v31 }
 0x2f8   : > { %1092 = vmatmul.msk.bf16.vlgmr.msra.gmra.mxu0 %vm596_vm1, %v754_v32 }
 0x352   : > { %v710_v33 = vpop.f32.mrf.mxu2 }
 0x353   : > { %715 = vrot.lane.b32.xlu2 %v710_v33, %s1528_s21 }
 0x35a   : > { %v712_v34 = vpop.f32.mrf.mxu2 }
 0x36e   : > { %v834_v35 = vpop.f32.mrf.mxu2 }
 0x36f   : > { %839 = vrot.lane.b32.xlu2 %v834_v35, %s1529_s3 }
 0x375   : > { %v772_v36 = vpop.f32.mrf.mxu0 }
 0x376   : > { %777 = vrot.lane.b32.xlu0 %v772_v36, %s1530_s20  ;;  %v836_v37 = vpop.f32.mrf.mxu2 }
 0x37d   : > { %v774_v38 = vpop.f32.mrf.mxu0 }
 0x3ad   : > { %v716_v39 = vpop.permute.xlu2 %715 }
 0x3ae   : > { %719 = vst.msk [vmem:[#allocation2] sm:$0xff] %vm718_vm3, %v716_v39 }
 0x3c9   : > { %v840_v43 = vpop.permute.xlu2 %839 }
 0x3e8   : > { %v778_v42 = vpop.permute.xlu0 %777 }
 0x3e9   : > { %781 = vst.msk [vmem:[#allocation2] sm:$0xff] %vm780_vm4, %v778_v42 }
 0x3ea   : > { %843 = vst.msk [vmem:[#allocation2] sm:$0xff] %vm842_vm5, %v840_v43 }
 0x3f1   : > { %v844_v44 = vld [vmem:[#allocation2] sm:$0xff] }
 0x3f2   : > { %v845_v45 = vpack.c.bf16 %v844_v44, %v844_v44 }
 0x3f4   : > { %1103 = vmatmul.msk.bf16.vlgmr.msra.gmra.mxu3 %vm527_vm0, %v845_v45 }
 0x477   : > { %v873_v47 = vpop.f32.mrf.mxu3 }
 0x478   : > { %v874_v48 = vadd.f32 %v1227_v46, %v873_v47 }
 0x47a   : > { %877 = vst.msk [vmem:[%s491_s9] sm:$0xff] %vm527_vm0, %v874_v48 }
 0x47b   : > { %1451 = shalt.err (!%p1448_p13)
}
 0x47c   : > { %1132 = dma.vmem_to_hbm [thread:$0]  (%p1661_p4), %s893_s19, 128, %s895_s17, %s879_s15  }
 0x47f   : > { %v875_v49 = vpop.f32.mrf.mxu3 }
 0x480 PF: > { %s1907_s8 = sld [smem:[#allocation20_spill]]  ;;  %p1155_p0 = pnand %p1053_p6, %p1669_p9 }
 0x481   : > { %s1909_s21 = sld [smem:[#allocation22_spill]] }
 0x482   : > { %p1156_p2 = pneg %p1155_p0 }
 0x486   : > { %s906_s3 = sand.u32 1, %s1907_s8  }
 0x487   : > { %s907_s20 = scalar_lea.sflag [#allocation5], %s906_s3 }
 0x488   : > { %1493 = dma.done.wait (%p1156_p2), %s907_s20, 128  }
 0x489   : > { %1495 = vsyncadd (%p1156_p2), %s907_s20, 4294967168  ;;  %s30_s14 = sadd.s32 1, %s1909_s21   ;;  %s1910_s16 = sld [smem:[#allocation25_spill]] }
 0x48a   : > { %p27_p7 = scmp.ge.s32.totalorder %s30_s14, 4   ;;  %s1911_s12 = sld [smem:[#allocation21_spill]] }
 0x48b   : > { %s1912_s13 = sld [smem:[#allocation23_spill]]  ;;  %s1913_s30 = smov %s1502_s10 }
 0x48c   : > { %s1914_s10 = smov %s1506_s11  ;;  %29 = sbr.rel (!%p27_p7) target bundleno = 17 (0x11), region = 137 }
 0x48f   : > { %s1915_s11 = smov %s1910_s16 }
 0x491   :  { %913 = vsyncpa [#allocation4], 1 }
 0x492   :  { %915 = vsyncpa [#allocation4 + $0x1], 1 }
 0x493   :  { %916 = vsyncpa [#allocation7], 1 }
 0x494   :  { %918 = vsyncpa [#allocation7 + $0x1], 1 }
 0x495   :  { %919 = vsyncpa [#allocation10], 1 }
 0x496   :  { %920 = vsyncpa [#allocation13], 1 }
 0x497   :  { %921 = vsyncpa [#allocation5], 1 }
 0x498   :  { %923 = vsyncpa [#allocation5 + $0x1], 1 }

</bundles_post_ra>
